<compile_context>
chip_gen: v6e
topology: v6e:2x2x1
jax: 0.10.0
libtpu: 0.0.40
codegen_flags: <defaults>
</compile_context>

<pallas_src>
import math

import jax
import jax.numpy as jnp
from jax.experimental import pallas as pl
from jax.experimental.pallas import tpu as pltpu


def _attn_kernel_k1(x_ref, w_ref, b_ref, o_ref):
    # x_ref: (tm, H)  input tile (H is a multiple of 128)
    # w_ref: (H, 1)   Linear weight (resident)
    # b_ref: (1, 1)   Linear bias, scalar in SMEM
    # o_ref: (tm, H)  output tile
    x = x_ref[...]
    score = jnp.dot(x, w_ref[...], preferred_element_type=jnp.float32) + b_ref[0, 0]
    attn = jax.nn.sigmoid(jnp.tanh(score))                      # (tm, 1) f32, EUP
    # lane-broadcast multiply on the VPU; final cast fused into the store
    o_ref[...] = (attn.astype(x.dtype) * x).astype(o_ref.dtype)


def _attn_kernel_packed(x_ref, w_ref, e_ref, b_ref, o_ref):
    # x_ref: (tm, Hp)  tile of packed input rows (Hp = k*H, lane-dense)
    # w_ref: (Hp, k)   block-diagonal weight -> one score per sub-row (MXU)
    # e_ref: (k, Hp)   0/1 expansion matrix: score_j -> its H lanes (MXU broadcast)
    # b_ref: (1, 1)    Linear bias, scalar in SMEM
    # o_ref: (tm, Hp)  output tile
    x = x_ref[...]
    score = jnp.dot(x, w_ref[...], preferred_element_type=jnp.float32) + b_ref[0, 0]
    attn = jax.nn.sigmoid(jnp.tanh(score)).astype(x.dtype)      # (tm, k)
    # broadcast each score across its H lanes via a cheap MXU matmul; keep the
    # intermediate in x.dtype (no full-tile f32 copy)
    attn_full = jnp.dot(attn, e_ref[...], preferred_element_type=x.dtype)
    o_ref[...] = (attn_full * x).astype(o_ref.dtype)


def _vmem_capacity_bytes():
    """Per-core VMEM capacity; conservative (v7x, 64 MiB/TC) default if query fails."""
    try:
        info = pltpu.get_tpu_info()
        cap = int(getattr(info, "vmem_capacity_bytes", 0))
        if cap > 0:
            return cap
    except Exception:
        pass
    return 64 * 1024 * 1024


def _stream_spec(shape, index_map, bufs):
    """BlockSpec with deeper multi-buffering when requested and supported."""
    if bufs is not None and bufs > 2:
        try:
            return pl.BlockSpec(shape, index_map, pipeline_mode=pl.Buffered(bufs))
        except Exception:
            pass  # older/newer API without pipeline_mode: default double-buffering
    return pl.BlockSpec(shape, index_map)


def self_attention(x, weight, bias):
    """x: (B, S, H); weight: (1, H) (torch Linear layout); bias: (1,). Returns (B, S, H)."""
    B, S, H = x.shape
    M = B * S
    dtype = x.dtype
    itemsize = jnp.dtype(dtype).itemsize

    # ---- lane packing: fold k rows per packed row so the lane dim is a multiple of 128
    k = 1 if H % 128 == 0 else 128 // math.gcd(H, 128)
    Hp = k * H
    row_bytes = Hp * itemsize
    sub = max(8, 32 // itemsize)                 # sublane packing: 8 f32 / 16 bf16 / 32 int8
    Mp_raw = pl.cdiv(M, k)                       # packed rows before tile padding

    # ---- per-generation VMEM budget (64 MiB/TC on v7x, 128 MiB on v5e/v6e)
    vmem_cap = _vmem_capacity_bytes()
    vmem_limit = (vmem_cap * 3) // 4             # 48 MiB v7x / 96 MiB v5e-v6e
    pipe_budget = vmem_limit // 2                # headroom for the streaming buffers
    n_buf_in = 3                                 # deeper input pipeline (if supported)
    live_per_row = (n_buf_in + 2 + 1) * row_bytes   # in bufs + out bufs + intermediate
    tm_vmem = max(sub, pipe_budget // live_per_row)

    # ---- tile size: byte target (~4 MiB/tile) rather than a row cap
    TILE_TARGET_BYTES = 4 * 1024 * 1024
    tm = max(sub, TILE_TARGET_BYTES // row_bytes)
    tm = min(tm, tm_vmem)
    # keep >= 4 grid steps on non-tiny inputs so megacore sharding (v7x: 2 TCs)
    # and the BlockSpec DMA pipeline have work to overlap (never grid == 1 there)
    if Mp_raw * row_bytes > 2 * 1024 * 1024:
        tm = min(tm, pl.cdiv(Mp_raw, 4))
    tm = min(tm, pl.cdiv(Mp_raw, sub) * sub)     # never pad beyond a single tile
    tm = max(sub, (tm // sub) * sub)             # sublane-aligned

    # ---- pad rows so packing and tiling divide evenly (no masked partial blocks)
    Mp = pl.cdiv(Mp_raw, tm) * tm
    M_pad = Mp * k
    x_flat = x.reshape(M, H)
    if M_pad != M:
        x_flat = jnp.pad(x_flat, ((0, M_pad - M), (0, 0)))   # zero rows -> attn*0 = 0
    x2 = x_flat.reshape(Mp, Hp)

    grid_len = Mp // tm
    bufs = n_buf_in if grid_len >= 3 else None

    w_vec = weight.reshape(H).astype(dtype)
    b2 = bias.reshape(1, 1).astype(jnp.float32)

    # memory-bound hint for XLA's scheduler
    mm_flops = 2 * Mp * Hp * k * (2 if k > 1 else 1)
    cost = pl.CostEstimate(
        flops=int(mm_flops + Mp * Hp),
        transcendentals=int(2 * Mp * k),
        bytes_accessed=int(2 * Mp * row_bytes),
    )
    compiler_params = pltpu.CompilerParams(
        dimension_semantics=("parallel",),
        vmem_limit_bytes=int(vmem_limit),
    )

    x_spec = _stream_spec((tm, Hp), lambda i: (i, 0), bufs)
    out_spec = pl.BlockSpec((tm, Hp), lambda i: (i, 0))
    smem_spec = pl.BlockSpec(memory_space=pltpu.MemorySpace.SMEM)

    if k == 1:
        w2 = w_vec[:, None]                                       # (H, 1)
        out = pl.pallas_call(
            _attn_kernel_k1,
            out_shape=jax.ShapeDtypeStruct((Mp, Hp), dtype),
            grid_spec=pltpu.PrefetchScalarGridSpec(
                num_scalar_prefetch=0,
                grid=(grid_len,),
                in_specs=[
                    x_spec,                                        # streamed input rows
                    pl.BlockSpec((Hp, 1), lambda i: (0, 0)),       # weight (resident)
                    smem_spec,                                     # bias scalar
                ],
                out_specs=out_spec,
            ),
            compiler_params=compiler_params,
            cost_estimate=cost,
        )(x2, w2, b2)
    else:
        # block-diagonal weight: column j holds w over rows [j*H, (j+1)*H)
        wbd = jnp.kron(jnp.eye(k, dtype=dtype), w_vec[:, None])               # (Hp, k)
        # expansion matrix: row j is 1 over lanes [j*H, (j+1)*H)
        expand = jnp.kron(jnp.eye(k, dtype=dtype), jnp.ones((1, H), dtype))   # (k, Hp)
        out = pl.pallas_call(
            _attn_kernel_packed,
            out_shape=jax.ShapeDtypeStruct((Mp, Hp), dtype),
            grid_spec=pltpu.PrefetchScalarGridSpec(
                num_scalar_prefetch=0,
                grid=(grid_len,),
                in_specs=[
                    x_spec,                                        # streamed packed rows
                    pl.BlockSpec((Hp, k), lambda i: (0, 0)),       # block-diag weight (resident)
                    pl.BlockSpec((k, Hp), lambda i: (0, 0)),       # expansion matrix (resident)
                    smem_spec,                                     # bias scalar
                ],
                out_specs=out_spec,
            ),
            compiler_params=compiler_params,
            cost_estimate=cost,
        )(x2, wbd, expand, b2)

    out_flat = out.reshape(M_pad, H)
    if M_pad != M:
        out_flat = out_flat[:M]
    return out_flat.reshape(B, S, H)


def self_attention_ref(x, weight, bias):
    score = jnp.einsum("bsh,oh->bso", x, weight) + bias   # (B, S, 1)
    attn = jax.nn.sigmoid(jnp.tanh(score))
    return attn * x


if __name__ == "__main__":
    key = jax.random.PRNGKey(0)

    # ---- small shape matching the module spec (B=2, S=8, H=32); k=4 packed path ----
    B, S, H = 2, 8, 32
    kx, kw, kb = jax.random.split(key, 3)
    x = jax.random.normal(kx, (B, S, H), dtype=jnp.float32)
    bound = 1.0 / math.sqrt(H)
    weight = jax.random.uniform(kw, (1, H), jnp.float32, -bound, bound)
    bias = jax.random.uniform(kb, (1,), jnp.float32, -bound, bound)

    out = jax.block_until_ready(self_attention(x, weight, bias))
    ref = self_attention_ref(x, weight, bias)
    assert out.shape == (B, S, H)
    assert jnp.allclose(out, ref, atol=1e-5, rtol=1e-5), "mismatch vs reference (small)"

    # ---- larger shape exercising the multi-step (grid >= 4), k=1 lane-dense path ----
    B2, S2, H2 = 8, 512, 256
    kx2, kw2, kb2 = jax.random.split(jax.random.PRNGKey(1), 3)
    x_l = jax.random.normal(kx2, (B2, S2, H2), dtype=jnp.float32)
    bound2 = 1.0 / math.sqrt(H2)
    w_l = jax.random.uniform(kw2, (1, H2), jnp.float32, -bound2, bound2)
    b_l = jax.random.uniform(kb2, (1,), jnp.float32, -bound2, bound2)

    out_l = jax.block_until_ready(self_attention(x_l, w_l, b_l))
    ref_l = self_attention_ref(x_l, w_l, b_l)
    assert out_l.shape == (B2, S2, H2)
    assert jnp.allclose(out_l, ref_l, atol=1e-4, rtol=1e-4), "mismatch vs reference (large)"

    # ---- M not a multiple of k: exercises the zero-row padding path (no k=1 fallback) ----
    B3, S3, H3 = 3, 5, 32
    kx3, kw3, kb3 = jax.random.split(jax.random.PRNGKey(2), 3)
    x_p = jax.random.normal(kx3, (B3, S3, H3), dtype=jnp.float32)
    bound3 = 1.0 / math.sqrt(H3)
    w_p = jax.random.uniform(kw3, (1, H3), jnp.float32, -bound3, bound3)
    b_p = jax.random.uniform(kb3, (1,), jnp.float32, -bound3, bound3)

    out_p = jax.block_until_ready(self_attention(x_p, w_p, b_p))
    ref_p = self_attention_ref(x_p, w_p, b_p)
    assert out_p.shape == (B3, S3, H3)
    assert jnp.allclose(out_p, ref_p, atol=1e-5, rtol=1e-5), "mismatch vs reference (padded)"

    print("KERNEL_OK")
</pallas_src>

<mosaic_0001>
module attributes {stable_mosaic.version = 11 : i64} {
  func.func @_attn_kernel_packed(%arg0: i32, %arg1: memref<8x128xf32, #tpu.memory_space<vmem>>, %arg2: memref<128x4xf32, #tpu.memory_space<vmem>>, %arg3: memref<4x128xf32, #tpu.memory_space<vmem>>, %arg4: memref<1x1xf32, #tpu.memory_space<smem>>, %arg5: memref<8x128xf32, #tpu.memory_space<vmem>>) attributes {dimension_semantics = [#tpu.dimension_semantics<parallel>], iteration_bounds = array<i64: 1>, scalar_prefetch = 0 : i64, scratch_operands = 0 : i64, tpu.core_type = #tpu.core_type<tc>, window_params = [{transform_indices = @transform_0, window_bounds = array<i64: 8, 128>}, {pipeline_mode = #tpu.pipeline_mode<synchronous>, transform_indices = @transform_1, window_bounds = array<i64: 128, 4>}, {pipeline_mode = #tpu.pipeline_mode<synchronous>, transform_indices = @transform_2, window_bounds = array<i64: 4, 128>}, {transform_indices = @transform_3, window_bounds = array<i64: 1, 1>}, {transform_indices = @transform_4, window_bounds = array<i64: 8, 128>}]} {
    %c0 = arith.constant 0 : index
    %c0_0 = arith.constant 0 : index
    %0 = vector.load %arg1[%c0, %c0_0] : memref<8x128xf32, #tpu.memory_space<vmem>>, vector<8x128xf32>
    %c0_1 = arith.constant 0 : index
    %c0_2 = arith.constant 0 : index
    %1 = vector.load %arg2[%c0_1, %c0_2] : memref<128x4xf32, #tpu.memory_space<vmem>>, vector<128x4xf32>
    %cst = arith.constant dense<0.000000e+00> : vector<8x4xf32>
    %2 = tpu.matmul %0, %1, %cst {dimension_numbers = #tpu.dot_dimension_numbers<[1], [0], [0], [1], [0, 0, 1, 1], [], []>} : vector<8x128xf32>, vector<128x4xf32>, vector<8x4xf32> -> vector<8x4xf32>
    %c0_3 = arith.constant 0 : index
    %c0_4 = arith.constant 0 : index
    %3 = memref.load %arg4[%c0_3, %c0_4] : memref<1x1xf32, #tpu.memory_space<smem>>
    %4 = vector.broadcast %3 : f32 to vector<8x4xf32>
    %5 = arith.addf %2, %4 : vector<8x4xf32>
    %6 = math.tanh %5 : vector<8x4xf32>
    %7 = arith.negf %6 : vector<8x4xf32>
    %8 = math.exp %7 : vector<8x4xf32>
    %cst_5 = arith.constant 1.000000e+00 : f32
    %9 = vector.broadcast %cst_5 : f32 to vector<8x4xf32>
    %10 = arith.addf %9, %8 : vector<8x4xf32>
    %11 = arith.divf %9, %10 : vector<8x4xf32>
    %c0_6 = arith.constant 0 : index
    %c0_7 = arith.constant 0 : index
    %12 = vector.load %arg3[%c0_6, %c0_7] : memref<4x128xf32, #tpu.memory_space<vmem>>, vector<4x128xf32>
    %cst_8 = arith.constant dense<0.000000e+00> : vector<8x128xf32>
    %13 = tpu.matmul %11, %12, %cst_8 {dimension_numbers = #tpu.dot_dimension_numbers<[1], [0], [0], [1], [0, 0, 1, 1], [], []>} : vector<8x4xf32>, vector<4x128xf32>, vector<8x128xf32> -> vector<8x128xf32>
    %14 = arith.mulf %13, %0 : vector<8x128xf32>
    %c0_9 = arith.constant 0 : index
    %c0_10 = arith.constant 0 : index
    %15 = vector.load %arg5[%c0_9, %c0_10] : memref<8x128xf32, #tpu.memory_space<vmem>>, vector<8x128xf32>
    tpu.vector_store %arg5[%c0_9, %c0_10], %14 {strides = array<i32>} : memref<8x128xf32, #tpu.memory_space<vmem>>, vector<8x128xf32>,
    return
  }
  func.func @transform_0(%arg0: i32) -> (i32, i32) {
    %c0_i32 = arith.constant 0 : i32
    %c0_i32_0 = arith.constant 0 : i32
    return %arg0, %c0_i32 : i32, i32
  }
  func.func @transform_1(%arg0: i32) -> (i32, i32) {
    %c0_i32 = arith.constant 0 : i32
    %c0_i32_0 = arith.constant 0 : i32
    %c0_i32_1 = arith.constant 0 : i32
    return %c0_i32, %c0_i32_0 : i32, i32
  }
  func.func @transform_2(%arg0: i32) -> (i32, i32) {
    %c0_i32 = arith.constant 0 : i32
    %c0_i32_0 = arith.constant 0 : i32
    %c0_i32_1 = arith.constant 0 : i32
    return %c0_i32, %c0_i32_0 : i32, i32
  }
  func.func @transform_3(%arg0: i32) -> (i32, i32) {
    %c0_i32 = arith.constant 0 : i32
    %c0_i32_0 = arith.constant 0 : i32
    %c0_i32_1 = arith.constant 0 : i32
    return %c0_i32, %c0_i32_0 : i32, i32
  }
  func.func @transform_4(%arg0: i32) -> (i32, i32) {
    %c0_i32 = arith.constant 0 : i32
    %c0_i32_0 = arith.constant 0 : i32
    return %arg0, %c0_i32 : i32, i32
  }
}

</mosaic_0001>

<bundles_post_ra>
// kernel: tpu_custom_call.1
= control target key start
LH: loop header
LB: loop body
LE: loop exit
PB: predicated region body
PF: predicated region fallthrough
CT: control target
= control target key end

     0   :  { %v303_v1 = vmov 0.0   ;;  %vm304_vm0 = vmmov 0   ;;  %s391_s0 = inlined_call_operand.vmem [shape: f32[8,128], index: 0, kind: input, shape index: {}]   ;;  %s392_s1 = inlined_call_operand.vmem [shape: f32[128,4], index: 1, kind: input, shape index: {}]   ;;  %s393_s2 = inlined_call_operand.vmem [shape: f32[4,128], index: 2, kind: input, shape index: {}]   ;;  %s394_s3 = inlined_call_operand.<no memory space> [shape: f32[1,1], index: 3, kind: input, shape index: {}]   ;;  %s395_s4 = inlined_call_operand.hbm [shape: f32[8,128], index: 4, kind: output, shape index: {}]  }
   0x1   :  { %v35_v0 = vld [vmem:[%s392_s1 + $0x78] sm:$0xff]  ;;  %232 = vmatprep.subr.mxu0 %v303_v1  ;;  %v34_v2 = vld [vmem:[%s392_s1 + $0x70] sm:$0xff]  ;;  %264 = vmatprep.mubr.msk.f32.mxu0 %vm304_vm0, %v303_v1  ;;  %v33_v3 = vld [vmem:[%s392_s1 + $0x68] sm:$0xff] }
   0x2   :  { %233 = vmatpush3.msra.mxu0 %v35_v0  ;;  %267 = vmatprep.subr.mxu1 %v303_v1  ;;  %v32_v4 = vld [vmem:[%s392_s1 + $0x60] sm:$0xff] }
   0x3   :  { %234 = vmatprep.subr.mxu0 %v303_v1  ;;  %269 = vmatprep.mubr.msk.f32.mxu1 %vm304_vm0, %v303_v1 }
   0x4   :  { %235 = vmatpush3.msra.mxu0 %v34_v2 }
   0x5   :  { %236 = vmatprep.subr.mxu0 %v303_v1 }
   0x6   :  { %10 = vsyncpa [#allocation4], 0  ;;  %237 = vmatpush3.msra.mxu0 %v33_v3  ;;  %v31_v5 = vld [vmem:[%s392_s1 + $0x58] sm:$0xff]  ;;  %v30_v6 = vld [vmem:[%s392_s1 + $0x50] sm:$0xff]  ;;  %vm120_vm1 = vcmask 1043456   ;;  %v37_v19 = vstv %s394_s3  ;;  %vm116_vm2 = vcmask 31744  }
   0x7   :  { %238 = vmatprep.subr.mxu0 %v303_v1  ;;  %v29_v7 = vld [vmem:[%s392_s1 + $0x48] sm:$0xff]  ;;  %v28_v8 = vld [vmem:[%s392_s1 + $0x40] sm:$0xff]  ;;  %v27_v9 = vld [vmem:[%s392_s1 + $0x38] sm:$0xff] }
   0x8   :  { %239 = vmatpush3.msra.mxu0 %v32_v4  ;;  %v26_v10 = vld [vmem:[%s392_s1 + $0x30] sm:$0xff]  ;;  %v25_v11 = vld [vmem:[%s392_s1 + $0x28] sm:$0xff]  ;;  %v24_v12 = vld [vmem:[%s392_s1 + $0x20] sm:$0xff] }
   0x9   :  { %240 = vmatprep.subr.mxu0 %v303_v1  ;;  %v23_v13 = vld [vmem:[%s392_s1 + $0x18] sm:$0xff]  ;;  %v22_v14 = vld [vmem:[%s392_s1 + $0x10] sm:$0xff]  ;;  %v21_v15 = vld [vmem:[%s392_s1 + $0x8] sm:$0xff] }
   0xa   :  { %241 = vmatpush3.msra.mxu0 %v31_v5  ;;  %v20_v16 = vld [vmem:[%s392_s1] sm:$0xff] }
   0xb   :  { %242 = vmatprep.subr.mxu0 %v303_v1  ;;  %v19_v17 = vld [vmem:[%s391_s0] sm:$0xff]  ;;  %s305_s0 = smov [#allocation3]  }
   0xc   :  { %243 = vmatpush3.msra.mxu0 %v30_v6  ;;  %v115_v18 = vld [vmem:[%s393_s2] sm:$0xf]  ;;  %s202_s1 = sshll.u32 %s305_s0, 4  ;;  %s203_s1 = int_to_ptr.vmem [resolvable:$true] %s202_s1 }
   0xd   :  { %244 = vmatprep.subr.mxu0 %v303_v1  ;;  %268 = vmatpush3.msk.msra.mxu1 %vm120_vm1, %v115_v18  ;;  %s281_s2 = scalar_lea.vmem %s203_s1, 128  ;;  %p286_p1 = scmp.lt.s32.totalorder %s203_s1, %s203_s1 }
   0xe   :  { %245 = vmatpush3.msra.mxu0 %v29_v7  ;;  %p282_p0 = scmp.ne.s32.totalorder %s203_s1, %s281_s2  ;;  %p287_p2 = scmp.lt.s32.totalorder %s281_s2, %s281_s2 }
   0xf   :  { %246 = vmatprep.subr.mxu0 %v303_v1 }
  0x10   :  { %247 = vmatpush3.msra.mxu0 %v28_v8  ;;  %p288_p3 = por %p287_p2, %p286_p1 }
  0x11   :  { %248 = vmatprep.subr.mxu0 %v303_v1 }
  0x12   :  { %249 = vmatpush3.msra.mxu0 %v27_v9  ;;  %p289_p4 = pnand %p288_p3, %p282_p0 }
  0x13   :  { %250 = vmatprep.subr.mxu0 %v303_v1 }
  0x14   :  { %251 = vmatpush3.msra.mxu0 %v26_v10 }
  0x15   :  { %252 = vmatprep.subr.mxu0 %v303_v1 }
  0x16   :  { %253 = vmatpush3.msra.mxu0 %v25_v11 }
  0x17   :  { %254 = vmatprep.subr.mxu0 %v303_v1 }
  0x18   :  { %255 = vmatpush3.msra.mxu0 %v24_v12 }
  0x19   :  { %256 = vmatprep.subr.mxu0 %v303_v1 }
  0x1a   :  { %257 = vmatpush3.msra.mxu0 %v23_v13 }
  0x1b   :  { %258 = vmatprep.subr.mxu0 %v303_v1 }
  0x1c   :  { %259 = vmatpush3.msra.mxu0 %v22_v14 }
  0x1d   :  { %260 = vmatprep.subr.mxu0 %v303_v1 }
  0x1e   :  { %261 = vmatpush3.msra.mxu0 %v21_v15 }
  0x1f   :  { %262 = vmatprep.subr.mxu0 %v303_v1 }
  0x20   :  { %263 = vmatpush3.msra.mxu0 %v20_v16 }
  0x21   :  { %265 = vmatmul.mubr.f32.vlgmr.msra.gmra.mxu0 %v19_v17 }
  0xe1   :  { %v104_v20 = vpop.f32.mrf.mxu0 }
  0xe2   :  { %v105_v21 = vadd.f32 %v104_v20, %v37_v19 }
  0xe3   :  { %v266_v22 = vpop.f32.mrf.mxu0 }
  0xe4   :  { %275 = vtanh.f32 %v105_v21 }
  0xf1   :  { %v276_v23 = vpop.eup %275 }
  0xf2   :  { %v210_v24 = vmul.f32 -1.442695, %v276_v23 }
  0xf4   :  { %277 = vpow2.f32 %v210_v24 }
 0x101   :  { %v278_v25 = vpop.eup %277 }
 0x102   :  { %v112_v26 = vadd.f32 1.0, %v278_v25 }
 0x104   :  { %279 = vrcp.f32 %v112_v26 }
 0x111   :  { %v280_v27 = vpop.eup %279 }
 0x112   :  { %270 = vmatmul.mubr.msk.f32.vlgmr.msra.gmra.mxu1 %vm116_vm2, %v280_v27 }
 0x1d2   :  { %v190_v28 = vpop.f32.mrf.mxu1 }
 0x1d3   :  { %v194_v29 = vmul.f32 %v190_v28, %v19_v17 }
 0x1d4   :  { %v271_v30 = vpop.f32.mrf.mxu1 }
 0x1d5   :  { %195 = vst [vmem:[#allocation3] sm:$0xff] %v194_v29 }
 0x1d6   :  { %292 = shalt.err (!%p289_p4)
}
 0x1d7   :  { %205 = dma.vmem_to_hbm [thread:$0]  %s203_s1, 128, %s395_s4, [#allocation4]  }
 0x1d8   :  { %301 = dma.done.wait [#allocation4], 128  }
 0x1d9   :  { %302 = vsyncadd [#allocation4], 4294967168 }
 0x1da   :  { %209 = vsyncpa [#allocation4], 1 }

</bundles_post_ra>
